<compile_context>
chip_gen: v6e
topology: v6e:2x2x1
jax: 0.10.0
libtpu: 0.0.40
codegen_flags: <defaults>
</compile_context>

<pallas_src>
import jax
import jax.numpy as jnp
from jax.experimental import pallas as pl
from jax.experimental.pallas import tpu as pltpu


# ---------------------------------------------------------------------------
# Small helpers (wrapper side, plain Python).
# ---------------------------------------------------------------------------
def _vmem_capacity_bytes():
    """Physical VMEM of the local TPU; conservative fallback (v7x) otherwise."""
    try:
        info = pltpu.get_tpu_info()
        cap = getattr(info, "vmem_capacity_bytes", None)
        if cap:
            return int(cap)
    except Exception:
        pass
    return 64 * 1024 * 1024


def _choose_tb(B, max_tb=256):
    """Largest divisor of B that keeps blocks (8,128)-legal, preferring >=2
    batch tiles so the 'parallel' grid axis is real on dual-core v7x."""
    divs = [d for d in range(1, B + 1) if B % d == 0]
    aligned = [d for d in divs if d % 8 == 0]
    two = [d for d in aligned if d <= max_tb and B // d >= 2]
    if two:
        return max(two)
    one = [d for d in aligned if d <= max_tb]
    if one:
        return max(one)
    return B  # block == full array dim is always legal


# ---------------------------------------------------------------------------
# Fused kernel factory.
#   grid = (B // tb, HW_pad // t_hw); batch axis "parallel", spatial "arbitrary"
#   x_ref    : (tb*Cin, t_hw)     image tile (bf16 or f32), rows = b*Cin + ci
#   wb_ref   : (Cin, L*C)         base-learner weights (already / HW), col l*C+c
#   bb_ref   : (1, L*C)           base-learner biases
#   wbig_ref : (4L^2*C, L*C)      block-diagonal per-class ensemble linears
#   blh_ref  : (1, L*C)           per-class ensemble biases
#   out_ref  : (tb, C)            ensemble output block
#   acc_ref  : (tb*Cin, 128)      f32 spatial-sum accumulator (scratch)
# ---------------------------------------------------------------------------
def _make_kernel(*, tb, cin, n_cls, n_lrn, groups, n_par):
    L, C = n_lrn, n_cls
    two_l = 2 * L

    def kernel(x_ref, wb_ref, bb_ref, wbig_ref, blh_ref, out_ref, acc_ref):
        k = pl.program_id(1)
        nk = pl.num_programs(1)
        f32 = jnp.float32

        # ---- stage 1: accumulate spatial sums for this tile -----------------
        @pl.when(k == 0)
        def _init():
            acc_ref[...] = jnp.zeros_like(acc_ref)

        # Per-group load + cast + add into a few independent partials
        # (no full-tile f32 temporary -> no spills), one acc write per step.
        parts = [None] * n_par
        for g in range(groups):
            v = x_ref[:, g * 128:(g + 1) * 128].astype(f32)
            j = g % n_par
            parts[j] = v if parts[j] is None else parts[j] + v
        total = parts[0]
        for j in range(1, n_par):
            if parts[j] is not None:
                total = total + parts[j]
        acc_ref[...] += total

        # ---- stage 2: finalize once per batch tile ---------------------------
        @pl.when(k == nk - 1)
        def _finalize():
            # Base learners (GAP -> linear -> sigmoid) in a flat learner-major
            # layout (column index = l*C + c).  1/HW is folded into wb, so only
            # a lane-sum and a (tb,1)x(1,L*C) broadcast multiply per channel.
            logits_b = None
            for ci in range(cin):
                if cin == 1:
                    slab = acc_ref[...]
                else:
                    slab = acc_ref[pl.ds(ci, tb, stride=cin), :]     # rows of channel ci
                s_ci = jnp.sum(slab, axis=-1, keepdims=True)         # (tb, 1)
                contrib = s_ci * wb_ref[ci:ci + 1, :]                # (tb, L*C)
                logits_b = contrib if logits_b is None else logits_b + contrib
            p = jax.nn.sigmoid(logits_b + bb_ref[...])               # (tb, L*C)

            # preds = [p, 1-p] over learners: (tb, 2L*C), index l'*C + c.
            v = jnp.concatenate([p, 1.0 - p], axis=-1)

            # Outer-product features, flattened as (p'*2L + q')*C + c, built by
            # lane-block concatenation (no constant rrep/rtile inputs at all).
            vq = jnp.concatenate([v] * two_l, axis=-1)               # (tb, 4L^2*C)
            vp = jnp.concatenate(
                [jnp.concatenate([v[:, p_ * C:(p_ + 1) * C]] * two_l, axis=-1)
                 for p_ in range(two_l)],
                axis=-1)                                             # (tb, 4L^2*C)
            feat = vp * vq

            # All per-class linears as ONE block-diagonal matmul.
            logits_h = jnp.dot(feat, wbig_ref[...],
                               preferred_element_type=f32) + blh_ref[...]

            # Per-class softmax over learners: learner l occupies the contiguous
            # lane slab [l*C, (l+1)*C), so max/sum are plain elementwise ops.
            slabs = [logits_h[:, l * C:(l + 1) * C] for l in range(L)]
            mx = slabs[0]
            for l in range(1, L):
                mx = jnp.maximum(mx, slabs[l])
            es = [jnp.exp(slabs[l] - mx) for l in range(L)]
            denom = es[0]
            for l in range(1, L):
                denom = denom + es[l]
            inv = pl.reciprocal(denom, approx=True)

            out = es[0] * inv * p[:, 0:C]
            for l in range(1, L):
                out = out + es[l] * inv * p[:, l * C:(l + 1) * C]
            out_ref[...] = out.astype(out_ref.dtype)

    return kernel


# ---------------------------------------------------------------------------
# Wrapper: layout, tile selection, parameter packing (all tiny, plain JAX).
# ---------------------------------------------------------------------------
def chest_xray_ensemble(x, base_w, base_b, lin_w, lin_b, *,
                        num_classes, n_learners, tb=None, t_hw=None):
    B, Cin, H, W = x.shape
    L, C = n_learners, num_classes
    LC = L * C
    HW = H * W
    f32 = jnp.float32

    # ---- streamed image as a dense 2-D slab (rows = b*Cin + ci) -------------
    # Keeping the caller's dtype (bf16 input halves HBM traffic of the only
    # large operand; in-kernel accumulation is f32 regardless).
    x2 = x.reshape(B * Cin, HW)
    hw_pad = -(-HW // 128) * 128
    if hw_pad != HW:
        # Zero-pad the spatial axis to a 128 multiple: zeros do not change the
        # spatial sum, and 1/HW below uses the true HW.
        x2 = jnp.pad(x2, ((0, 0), (0, hw_pad - HW)))
    bpe = x2.dtype.itemsize

    # ---- batch tiling --------------------------------------------------------
    if tb is None:
        tb = _choose_tb(B)
    assert B % tb == 0 and (tb % 8 == 0 or tb == B)
    tr = tb * Cin  # rows per batch tile

    # ---- per-generation VMEM budget & spatial tile ---------------------------
    vmem_cap = _vmem_capacity_bytes()                       # 128 MiB v5e/v6e, 64 MiB v7x
    vmem_limit = max(16 << 20, min((vmem_cap * 3) // 4, 100 << 20))
    w_bytes = 4 * (Cin * LC + LC + 4 * L * L * C * LC + LC)             # f32 constants
    head_tmp = 4 * tb * (4 * L * L * C) * 6                              # finalize temps
    fixed = 2 * w_bytes + tr * 128 * 4 + 2 * tb * C * 4 + head_tmp
    x_budget = max(2 * tr * 128 * bpe, vmem_limit - fixed - (6 << 20))

    if t_hw is None:
        m = hw_pad // 128
        max_d = max(1, min(512, x_budget // (2 * tr * 128 * bpe)))       # 512 caps unroll
        d = 1
        for cand in range(1, m + 1):
            if m % cand == 0 and cand <= max_d:
                d = cand
        t_hw = 128 * d
    assert t_hw % 128 == 0 and hw_pad % t_hw == 0
    groups = t_hw // 128

    # Independent partials only help when the per-partial vreg count is small.
    vregs_pp = max(1, (tr + 7) // 8)
    n_par = max(1, min(4, 32 // vregs_pp, groups))

    # Make sure the compiler limit covers a caller-overridden tile too.
    needed = fixed + 2 * tr * t_hw * bpe + (6 << 20)
    vmem_limit = max(vmem_limit, min(needed, (vmem_cap * 9) // 10))

    # ---- parameter packing (flat learner-major layout: column = l*C + c) ----
    wb = (jnp.transpose(base_w, (1, 0, 2)).reshape(Cin, LC) / float(HW)).astype(f32)
    bb = base_b.reshape(1, LC).astype(f32)
    # Block-diagonal per-class linear: wbig[(pq)*C + c, l*C + c] = lin_w[c, pq, l]
    wbig = jnp.einsum('cpl,cd->pcld', lin_w.astype(f32),
                      jnp.eye(C, dtype=f32)).reshape(4 * L * L * C, LC)
    blh = jnp.transpose(lin_b).reshape(1, LC).astype(f32)

    grid = (B // tb, hw_pad // t_hw)
    kernel = _make_kernel(tb=tb, cin=Cin, n_cls=C, n_lrn=L,
                          groups=groups, n_par=n_par)

    out = pl.pallas_call(
        kernel,
        out_shape=jax.ShapeDtypeStruct((B, C), f32),
        grid_spec=pltpu.PrefetchScalarGridSpec(
            num_scalar_prefetch=0,
            grid=grid,
            in_specs=[
                pl.BlockSpec((tr, t_hw), lambda i, k: (i, k)),
                pl.BlockSpec((Cin, LC), lambda i, k: (0, 0)),
                pl.BlockSpec((1, LC), lambda i, k: (0, 0)),
                pl.BlockSpec((4 * L * L * C, LC), lambda i, k: (0, 0)),
                pl.BlockSpec((1, LC), lambda i, k: (0, 0)),
            ],
            out_specs=pl.BlockSpec((tb, C), lambda i, k: (i, 0)),
            scratch_shapes=[pltpu.VMEM((tr, 128), f32)],
        ),
        compiler_params=pltpu.CompilerParams(
            dimension_semantics=("parallel", "arbitrary"),
            vmem_limit_bytes=int(vmem_limit),
        ),
    )(x2, wb, bb, wbig, blh)
    return out  # (B, C), matching the torch module's output layout


# ---------------------------------------------------------------------------
# Pure-JAX reference (mirrors the PyTorch forward, given the same synthetic
# base learners and the same input dtype).
# ---------------------------------------------------------------------------
def reference(x, base_w, base_b, lin_w, lin_b, *, num_classes, n_learners):
    B, Cin, H, W = x.shape
    L = n_learners
    xf = x.astype(jnp.float32)
    pooled = jnp.mean(xf.reshape(B, Cin, -1), axis=2)
    preds_all = jax.nn.sigmoid(
        jnp.einsum('bi,lic->blc', pooled, base_w.astype(jnp.float32))
        + base_b[None].astype(jnp.float32))                            # (B, L, C)
    outs = []
    for c in range(num_classes):
        v = jnp.concatenate([preds_all[:, :, c], 1.0 - preds_all[:, :, c]],
                            axis=1)                                    # (B, 2L)
        feat = (v[:, :, None] * v[:, None, :]).reshape(B, 4 * L * L)
        logits = feat @ lin_w[c] + lin_b[c]
        wts = jax.nn.softmax(logits, axis=1)
        outs.append(jnp.sum(wts * preds_all[:, :, c], axis=1, keepdims=True))
    return jnp.concatenate(outs, axis=1)


if __name__ == "__main__":
    B, Cin, H, W = 2, 4, 16, 16
    num_classes, n_learners = 3, 2
    L = n_learners

    key = jax.random.PRNGKey(0)
    k1, k2, k3, k4, k5 = jax.random.split(key, 5)
    # bf16 image: halves the HBM->VMEM traffic of the only large input.
    x = jax.random.normal(k1, (B, Cin, H, W), jnp.float32).astype(jnp.bfloat16)
    # synthetic frozen base learners: (L, Cin, C) weights, (L, C) biases
    base_w = 0.5 * jax.random.normal(k2, (L, Cin, num_classes), jnp.float32)
    base_b = 0.1 * jax.random.normal(k3, (L, num_classes), jnp.float32)
    # per-class ensemble linears (nn.Linear(4*L*L, L)), stored as (in, out)
    lin_w = 0.3 * jax.random.normal(k4, (num_classes, 4 * L * L, L), jnp.float32)
    lin_b = 0.1 * jax.random.normal(k5, (num_classes, L), jnp.float32)

    ref = reference(x, base_w, base_b, lin_w, lin_b,
                    num_classes=num_classes, n_learners=n_learners)

    # (a) t_hw=128 forces two spatial grid steps: exercises the accumulator path.
    out_a = chest_xray_ensemble(x, base_w, base_b, lin_w, lin_b,
                                num_classes=num_classes, n_learners=n_learners,
                                t_hw=128)
    out_a = jax.block_until_ready(out_a)
    # (b) automatic tile selection: single spatial step, multi-group inner loop.
    out_b = chest_xray_ensemble(x, base_w, base_b, lin_w, lin_b,
                                num_classes=num_classes, n_learners=n_learners)
    out_b = jax.block_until_ready(out_b)

    for out in (out_a, out_b):
        assert out.shape == (B, num_classes)
        # Tolerance covers the approx-mode EUP reciprocal in the softmax denom.
        assert jnp.allclose(out, ref, atol=5e-3, rtol=5e-3), (out, ref)
    print("KERNEL_OK")
</pallas_src>

<mosaic_0001>
module attributes {stable_mosaic.version = 11 : i64} {
  func.func @kernel(%arg0: i32, %arg1: i32, %arg2: memref<8x128xbf16, #tpu.memory_space<vmem>>, %arg3: memref<4x6xf32, #tpu.memory_space<vmem>>, %arg4: memref<1x6xf32, #tpu.memory_space<vmem>>, %arg5: memref<48x6xf32, #tpu.memory_space<vmem>>, %arg6: memref<1x6xf32, #tpu.memory_space<vmem>>, %arg7: memref<2x3xf32, #tpu.memory_space<vmem>>, %arg8: memref<8x128xf32, #tpu.memory_space<vmem>>) attributes {dimension_semantics = [#tpu.dimension_semantics<parallel>, #tpu.dimension_semantics<arbitrary>], iteration_bounds = array<i64: 1, 2>, scalar_prefetch = 0 : i64, scratch_operands = 1 : i64, tpu.core_type = #tpu.core_type<tc>, window_params = [{transform_indices = @transform_0, window_bounds = array<i64: 8, 128>}, {pipeline_mode = #tpu.pipeline_mode<synchronous>, transform_indices = @transform_1, window_bounds = array<i64: 4, 6>}, {pipeline_mode = #tpu.pipeline_mode<synchronous>, transform_indices = @transform_2, window_bounds = array<i64: 1, 6>}, {pipeline_mode = #tpu.pipeline_mode<synchronous>, transform_indices = @transform_3, window_bounds = array<i64: 48, 6>}, {pipeline_mode = #tpu.pipeline_mode<synchronous>, transform_indices = @transform_4, window_bounds = array<i64: 1, 6>}, {transform_indices = @transform_5, window_bounds = array<i64: 2, 3>}]} {
    %c0_i32 = arith.constant 0 : i32
    %0 = arith.cmpi eq, %arg1, %c0_i32 : i32
    %1 = arith.extui %0 : i1 to i32
    %c0_i32_0 = arith.constant 0 : i32
    %2 = arith.cmpi ne, %1, %c0_i32_0 : i32
    scf.if %2 {
      %cst = arith.constant 0.000000e+00 : f32
      %11 = vector.broadcast %cst : f32 to vector<8x128xf32>
      %c0_7 = arith.constant 0 : index
      %c0_8 = arith.constant 0 : index
      %12 = vector.load %arg8[%c0_7, %c0_8] : memref<8x128xf32, #tpu.memory_space<vmem>>, vector<8x128xf32>
      tpu.vector_store %arg8[%c0_7, %c0_8], %11 {strides = array<i32>} : memref<8x128xf32, #tpu.memory_space<vmem>>, vector<8x128xf32>,
    } else {
    }
    %c0 = arith.constant 0 : index
    %c0_1 = arith.constant 0 : index
    %3 = vector.load %arg2[%c0, %c0_1] : memref<8x128xbf16, #tpu.memory_space<vmem>>, vector<8x128xbf16>
    %4 = arith.extf %3 : vector<8x128xbf16> to vector<8x128xf32>
    %c0_2 = arith.constant 0 : index
    %c0_3 = arith.constant 0 : index
    %5 = vector.load %arg8[%c0_2, %c0_3] : memref<8x128xf32, #tpu.memory_space<vmem>>, vector<8x128xf32>
    %6 = arith.addf %5, %4 : vector<8x128xf32>
    %c0_4 = arith.constant 0 : index
    %c0_5 = arith.constant 0 : index
    %7 = vector.load %arg8[%c0_4, %c0_5] : memref<8x128xf32, #tpu.memory_space<vmem>>, vector<8x128xf32>
    tpu.vector_store %arg8[%c0_4, %c0_5], %6 {strides = array<i32>} : memref<8x128xf32, #tpu.memory_space<vmem>>, vector<8x128xf32>,
    %c1_i32 = arith.constant 1 : i32
    %8 = arith.cmpi eq, %arg1, %c1_i32 : i32
    %9 = arith.extui %8 : i1 to i32
    %c0_i32_6 = arith.constant 0 : i32
    %10 = arith.cmpi ne, %9, %c0_i32_6 : i32
    scf.if %10 {
      %c0_7 = arith.constant 0 : index
      %c0_8 = arith.constant 0 : index
      %11 = tpu.strided_load %arg8[%c0_7, %c0_8] {strides = array<i32: 4, 1>} : memref<8x128xf32, #tpu.memory_space<vmem>>, vector<2x128xf32>
      %cst = arith.constant dense<0.000000e+00> : vector<2xf32>
      %12 = vector.multi_reduction <add>, %11, %cst [1] : vector<2x128xf32> to vector<2xf32>
      %13 = vector.shape_cast %12 : vector<2xf32> to vector<2x1xf32>
      %c0_9 = arith.constant 0 : index
      %c0_10 = arith.constant 0 : index
      %14 = vector.load %arg3[%c0_9, %c0_10] : memref<4x6xf32, #tpu.memory_space<vmem>>, vector<1x6xf32>
      %15 = vector.broadcast %13 : vector<2x1xf32> to vector<2x6xf32>
      %16 = vector.broadcast %14 : vector<1x6xf32> to vector<2x6xf32>
      %17 = arith.mulf %15, %16 : vector<2x6xf32>
      %c1 = arith.constant 1 : index
      %c0_11 = arith.constant 0 : index
      %18 = tpu.strided_load %arg8[%c1, %c0_11] {strides = array<i32: 4, 1>} : memref<8x128xf32, #tpu.memory_space<vmem>>, vector<2x128xf32>
      %cst_12 = arith.constant dense<0.000000e+00> : vector<2xf32>
      %19 = vector.multi_reduction <add>, %18, %cst_12 [1] : vector<2x128xf32> to vector<2xf32>
      %20 = vector.shape_cast %19 : vector<2xf32> to vector<2x1xf32>
      %c1_13 = arith.constant 1 : index
      %c0_14 = arith.constant 0 : index
      %21 = vector.load %arg3[%c1_13, %c0_14] : memref<4x6xf32, #tpu.memory_space<vmem>>, vector<1x6xf32>
      %22 = vector.broadcast %20 : vector<2x1xf32> to vector<2x6xf32>
      %23 = vector.broadcast %21 : vector<1x6xf32> to vector<2x6xf32>
      %24 = arith.mulf %22, %23 : vector<2x6xf32>
      %25 = arith.addf %17, %24 : vector<2x6xf32>
      %c2 = arith.constant 2 : index
      %c0_15 = arith.constant 0 : index
      %26 = tpu.strided_load %arg8[%c2, %c0_15] {strides = array<i32: 4, 1>} : memref<8x128xf32, #tpu.memory_space<vmem>>, vector<2x128xf32>
      %cst_16 = arith.constant dense<0.000000e+00> : vector<2xf32>
      %27 = vector.multi_reduction <add>, %26, %cst_16 [1] : vector<2x128xf32> to vector<2xf32>
      %28 = vector.shape_cast %27 : vector<2xf32> to vector<2x1xf32>
      %c2_17 = arith.constant 2 : index
      %c0_18 = arith.constant 0 : index
      %29 = vector.load %arg3[%c2_17, %c0_18] : memref<4x6xf32, #tpu.memory_space<vmem>>, vector<1x6xf32>
      %30 = vector.broadcast %28 : vector<2x1xf32> to vector<2x6xf32>
      %31 = vector.broadcast %29 : vector<1x6xf32> to vector<2x6xf32>
      %32 = arith.mulf %30, %31 : vector<2x6xf32>
      %33 = arith.addf %25, %32 : vector<2x6xf32>
      %c3 = arith.constant 3 : index
      %c0_19 = arith.constant 0 : index
      %34 = tpu.strided_load %arg8[%c3, %c0_19] {strides = array<i32: 4, 1>} : memref<8x128xf32, #tpu.memory_space<vmem>>, vector<2x128xf32>
      %cst_20 = arith.constant dense<0.000000e+00> : vector<2xf32>
      %35 = vector.multi_reduction <add>, %34, %cst_20 [1] : vector<2x128xf32> to vector<2xf32>
      %36 = vector.shape_cast %35 : vector<2xf32> to vector<2x1xf32>
      %c3_21 = arith.constant 3 : index
      %c0_22 = arith.constant 0 : index
      %37 = vector.load %arg3[%c3_21, %c0_22] : memref<4x6xf32, #tpu.memory_space<vmem>>, vector<1x6xf32>
      %38 = vector.broadcast %36 : vector<2x1xf32> to vector<2x6xf32>
      %39 = vector.broadcast %37 : vector<1x6xf32> to vector<2x6xf32>
      %40 = arith.mulf %38, %39 : vector<2x6xf32>
      %41 = arith.addf %33, %40 : vector<2x6xf32>
      %c0_23 = arith.constant 0 : index
      %c0_24 = arith.constant 0 : index
      %42 = vector.load %arg4[%c0_23, %c0_24] : memref<1x6xf32, #tpu.memory_space<vmem>>, vector<1x6xf32>
      %43 = vector.broadcast %42 : vector<1x6xf32> to vector<2x6xf32>
      %44 = arith.addf %41, %43 : vector<2x6xf32>
      %45 = arith.negf %44 : vector<2x6xf32>
      %46 = math.exp %45 : vector<2x6xf32>
      %cst_25 = arith.constant 1.000000e+00 : f32
      %47 = vector.broadcast %cst_25 : f32 to vector<2x6xf32>
      %48 = arith.addf %47, %46 : vector<2x6xf32>
      %49 = arith.divf %47, %48 : vector<2x6xf32>
      %cst_26 = arith.constant 1.000000e+00 : f32
      %50 = vector.broadcast %cst_26 : f32 to vector<2x6xf32>
      %51 = arith.subf %50, %49 : vector<2x6xf32>
      %52 = tpu.concatenate %49, %51 in 1 : vector<2x6xf32>, vector<2x6xf32> -> vector<2x12xf32>
      %53 = tpu.concatenate %52, %52, %52, %52 in 1 : vector<2x12xf32>, vector<2x12xf32>, vector<2x12xf32>, vector<2x12xf32> -> vector<2x48xf32>
      %54 = vector.extract_strided_slice %52 {offsets = [0, 0], sizes = [2, 3], strides = [1, 1]} : vector<2x12xf32> to vector<2x3xf32>
      %55 = tpu.concatenate %54, %54, %54, %54 in 1 : vector<2x3xf32>, vector<2x3xf32>, vector<2x3xf32>, vector<2x3xf32> -> vector<2x12xf32>
      %56 = vector.extract_strided_slice %52 {offsets = [0, 3], sizes = [2, 3], strides = [1, 1]} : vector<2x12xf32> to vector<2x3xf32>
      %57 = tpu.concatenate %56, %56, %56, %56 in 1 : vector<2x3xf32>, vector<2x3xf32>, vector<2x3xf32>, vector<2x3xf32> -> vector<2x12xf32>
      %58 = vector.extract_strided_slice %52 {offsets = [0, 6], sizes = [2, 3], strides = [1, 1]} : vector<2x12xf32> to vector<2x3xf32>
      %59 = tpu.concatenate %58, %58, %58, %58 in 1 : vector<2x3xf32>, vector<2x3xf32>, vector<2x3xf32>, vector<2x3xf32> -> vector<2x12xf32>
      %60 = vector.extract_strided_slice %52 {offsets = [0, 9], sizes = [2, 3], strides = [1, 1]} : vector<2x12xf32> to vector<2x3xf32>
      %61 = tpu.concatenate %60, %60, %60, %60 in 1 : vector<2x3xf32>, vector<2x3xf32>, vector<2x3xf32>, vector<2x3xf32> -> vector<2x12xf32>
      %62 = tpu.concatenate %55, %57, %59, %61 in 1 : vector<2x12xf32>, vector<2x12xf32>, vector<2x12xf32>, vector<2x12xf32> -> vector<2x48xf32>
      %63 = arith.mulf %62, %53 : vector<2x48xf32>
      %c0_27 = arith.constant 0 : index
      %c0_28 = arith.constant 0 : index
      %64 = vector.load %arg5[%c0_27, %c0_28] : memref<48x6xf32, #tpu.memory_space<vmem>>, vector<48x6xf32>
      %cst_29 = arith.constant dense<0.000000e+00> : vector<2x6xf32>
      %65 = tpu.matmul %63, %64, %cst_29 {dimension_numbers = #tpu.dot_dimension_numbers<[1], [0], [0], [1], [0, 0, 1, 1], [], []>} : vector<2x48xf32>, vector<48x6xf32>, vector<2x6xf32> -> vector<2x6xf32>
      %c0_30 = arith.constant 0 : index
      %c0_31 = arith.constant 0 : index
      %66 = vector.load %arg6[%c0_30, %c0_31] : memref<1x6xf32, #tpu.memory_space<vmem>>, vector<1x6xf32>
      %67 = vector.broadcast %66 : vector<1x6xf32> to vector<2x6xf32>
      %68 = arith.addf %65, %67 : vector<2x6xf32>
      %69 = vector.extract_strided_slice %68 {offsets = [0, 0], sizes = [2, 3], strides = [1, 1]} : vector<2x6xf32> to vector<2x3xf32>
      %70 = vector.extract_strided_slice %68 {offsets = [0, 3], sizes = [2, 3], strides = [1, 1]} : vector<2x6xf32> to vector<2x3xf32>
      %71 = arith.maximumf %69, %70 : vector<2x3xf32>
      %72 = arith.subf %69, %71 : vector<2x3xf32>
      %73 = math.exp %72 : vector<2x3xf32>
      %74 = arith.subf %70, %71 : vector<2x3xf32>
      %75 = math.exp %74 : vector<2x3xf32>
      %76 = arith.addf %73, %75 : vector<2x3xf32>
      %77 = tpu.reciprocal %76 {approx = true} : vector<2x3xf32> -> vector<2x3xf32>
      %78 = arith.mulf %73, %77 : vector<2x3xf32>
      %79 = vector.extract_strided_slice %49 {offsets = [0, 0], sizes = [2, 3], strides = [1, 1]} : vector<2x6xf32> to vector<2x3xf32>
      %80 = arith.mulf %78, %79 : vector<2x3xf32>
      %81 = arith.mulf %75, %77 : vector<2x3xf32>
      %82 = vector.extract_strided_slice %49 {offsets = [0, 3], sizes = [2, 3], strides = [1, 1]} : vector<2x6xf32> to vector<2x3xf32>
      %83 = arith.mulf %81, %82 : vector<2x3xf32>
      %84 = arith.addf %80, %83 : vector<2x3xf32>
      %c0_32 = arith.constant 0 : index
      %c0_33 = arith.constant 0 : index
      %85 = vector.load %arg7[%c0_32, %c0_33] : memref<2x3xf32, #tpu.memory_space<vmem>>, vector<2x3xf32>
      tpu.vector_store %arg7[%c0_32, %c0_33], %84 {strides = array<i32>} : memref<2x3xf32, #tpu.memory_space<vmem>>, vector<2x3xf32>,
    } else {
    }
    return
  }
  func.func @transform_0(%arg0: i32, %arg1: i32) -> (i32, i32) {
    %c0_i32 = arith.constant 0 : i32
    return %arg0, %arg1 : i32, i32
  }
  func.func @transform_1(%arg0: i32, %arg1: i32) -> (i32, i32) {
    %c0_i32 = arith.constant 0 : i32
    %c0_i32_0 = arith.constant 0 : i32
    %c0_i32_1 = arith.constant 0 : i32
    return %c0_i32, %c0_i32_0 : i32, i32
  }
  func.func @transform_2(%arg0: i32, %arg1: i32) -> (i32, i32) {
    %c0_i32 = arith.constant 0 : i32
    %c0_i32_0 = arith.constant 0 : i32
    %c0_i32_1 = arith.constant 0 : i32
    return %c0_i32, %c0_i32_0 : i32, i32
  }
  func.func @transform_3(%arg0: i32, %arg1: i32) -> (i32, i32) {
    %c0_i32 = arith.constant 0 : i32
    %c0_i32_0 = arith.constant 0 : i32
    %c0_i32_1 = arith.constant 0 : i32
    return %c0_i32, %c0_i32_0 : i32, i32
  }
  func.func @transform_4(%arg0: i32, %arg1: i32) -> (i32, i32) {
    %c0_i32 = arith.constant 0 : i32
    %c0_i32_0 = arith.constant 0 : i32
    %c0_i32_1 = arith.constant 0 : i32
    return %c0_i32, %c0_i32_0 : i32, i32
  }
  func.func @transform_5(%arg0: i32, %arg1: i32) -> (i32, i32) {
    %c0_i32 = arith.constant 0 : i32
    %c0_i32_0 = arith.constant 0 : i32
    return %arg0, %c0_i32 : i32, i32
  }
}

</mosaic_0001>

<bundles_post_ra>
// kernel: tpu_custom_call.1
= control target key start
LH: loop header
LB: loop body
LE: loop exit
PB: predicated region body
PF: predicated region fallthrough
CT: control target
= control target key end

     0   :  { %10 = vsyncpa [#allocation4], 0  ;;  %s762_s18 = smov 0   ;;  %s764_s19 = smov 0   ;;  %s894_s0 = inlined_call_operand.vmem [shape: bf16[8,256], index: 0, kind: input, shape index: {}]   ;;  %s895_s1 = inlined_call_operand.vmem [shape: f32[4,6], index: 1, kind: input, shape index: {}]   ;;  %s896_s2 = inlined_call_operand.vmem [shape: f32[1,6], index: 2, kind: input, shape index: {}]   ;;  %s897_s3 = inlined_call_operand.vmem [shape: f32[48,6], index: 3, kind: input, shape index: {}]   ;;  %s898_s4 = inlined_call_operand.vmem [shape: f32[1,6], index: 4, kind: input, shape index: {}]   ;;  %s899_s5 = inlined_call_operand.hbm [shape: f32[2,3], index: 5, kind: output, shape index: {}]  }
   0x1   :  { %s766_s20 = smov 0  }
   0x2 LB: > { %s573_s21 = sadd.s32 4294967295, %s717_s20   ;;  %s25_s22 = sadd.s32 1, %s713_s19  ;;  %s717_s20 = sphi %s766_s20, %s16_s20   ;;  %s713_s19 = sphi %s764_s19, %s902_s19   ;;  %s709_s18 = sphi %s762_s18, %s901_s18  }
   0x3   : > { %p26_p0 = scmp.ge.s32.totalorder %s25_s22, 2  ;;  %p576_p1 = scmp.ge.s32.totalorder %s717_s20, 1 }
   0x4   : > { %p205_p2 = scmp.lt.s32.totalorder %s717_s20, 3 }
   0x5   : > { %s904_s22 = smov (%p26_p0, %s25_s22), 0 }
   0x6   : > { %p206_p3 = pnand %p576_p1, %p205_p2 }
   0x7   : > { %p233_p4 = scmp.lt.s32.totalorder (!%p206_p3), %s709_s18, 1  ;;  %p578_p5 = scmp.ne.s32.totalorder (!%p206_p3), %s709_s18, 0 }
   0x8   : > { %209 = sbr.rel (%p206_p3) target bundleno = 1417 (0x589), region = 40 }
   0xd   : > { %s234_s23 = scalar_select %p233_p4, %s709_s18, 1 }
   0xe   : > { %242 = sbr.rel (%p578_p5) target bundleno = 21 (0x15), region = 44 }
   0xf   : > { %s577_s24 = sshll.u32 %s234_s23, 2 }
  0x10   : > { %s238_s27 = scalar_lea.vmem %s894_s0, %s577_s24 }
  0x13   : > { %v719_v0 = vmov 0.0  }
  0x14   : > { %243 = vst [vmem:[#allocation2] sm:$0xff] %v719_v0 }
  0x15 PF: > { %v244_v1 = vld [vmem:[%s238_s27] sm:$0xf]  ;;  %p579_p6 = scmp.ne.s32.totalorder %s709_s18, 1 }
  0x16   : > { %v245_v3 = vunpack.c.l.bf16 %v244_v1  ;;  %s720_s13 = smov (!%p579_p6), 6   ;;  %s721_s14 = smov (!%p579_p6), 125  }
  0x17   : > { %s722_s15 = smov (!%p579_p6), 9   ;;  %s723_s16 = smov (!%p579_p6), 3  }
  0x18   : > { %s724_s17 = smov (!%p579_p6), 122   ;;  %s725_s18 = smov (!%p579_p6), 119  }
  0x19   : > { %s726_s23 = smov (!%p579_p6), 12   ;;  %s727_s24 = smov (!%p579_p6), 24  }
  0x1a   : > { %252 = sbr.rel (%p579_p6) target bundleno = 1402 (0x57a), region = 48  ;;  %s728_s25 = smov (!%p579_p6), 36  }
  0x1b   : > { %v246_v2 = vld [vmem:[#allocation2] sm:$0xff] }
  0x1c   : > { %v247_v4 = vadd.f32 %v246_v2, %v245_v3 }
  0x1e   : > { %248 = vst [vmem:[#allocation2] sm:$0xff] %v247_v4 }
  0x1f   : > { %vm254_vm0 = vcmask 1041408   ;;  %v580_v15 = vld [vmem:[%s895_s1] ss:$0 sm:$0xff]  ;;  %v581_v16 = vld [vmem:[%s895_s1 + $0x1] ss:$0 sm:$0xff]  ;;  %vm319_vm1 = vcmask 48128  }
  0x20   : > { %v582_v17 = vld [vmem:[%s895_s1 + $0x2] ss:$0 sm:$0xff]  ;;  %v583_v19 = vld [vmem:[%s895_s1 + $0x3] ss:$0 sm:$0xff]  ;;  %v584_v27 = vld [vmem:[%s896_s2] ss:$0 sm:$0xff] }
  0x21   : > { %v729_v37 = vmov 0.0   ;;  %v390_v38 = vld [vmem:[%s897_s3 + $0x28] sm:$0xff]  ;;  %v389_v39 = vld [vmem:[%s897_s3 + $0x20] sm:$0xff]  ;;  %v388_v40 = vld [vmem:[%s897_s3 + $0x18] sm:$0xff]  ;;  %vm346_vm2 = vcmask 23552   ;;  %vm349_vm3 = vcmask 72704  }
  0x22   : > { %599 = vmatprep.subr.mxu0 %v729_v37  ;;  %v387_v41 = vld [vmem:[%s897_s3 + $0x10] sm:$0xff]  ;;  %v386_v44 = vld [vmem:[%s897_s3 + $0x8] sm:$0xff]  ;;  %v385_v47 = vld [vmem:[%s897_s3] sm:$0xff]  ;;  %vm730_vm4 = vmmov 0   ;;  %vm331_vm5 = vcmask 97280   ;;  %vm333_vm6 = vcmask 195584  }
  0x23   : > { %600 = vmatpush3.msra.mxu0 %v390_v38  ;;  %611 = vmatprep.mubr.msk.f32.mxu0 %vm730_vm4, %v729_v37  ;;  %vm335_vm7 = vcmask 293888   ;;  %vm398_vm8 = vcmask 392192   ;;  %vm506_vm9 = vcmask 17408  }
  0x24   : > { %601 = vmatprep.subr.mxu0 %v729_v37 }
  0x25   : > { %v253_v5 = vld [vmem:[#allocation2] ss:$4 sm:$0x3]  ;;  %v277_v7 = vld [vmem:[#allocation2 + $0x2] ss:$4 sm:$0x3]  ;;  %602 = vmatpush3.msra.mxu0 %v389_v39 }
  0x26   : > { %v255_v6 = vsel %vm254_vm0, %v253_v5, 0.0  ;;  %v278_v8 = vsel %vm254_vm0, %v277_v7, 0.0  ;;  %v265_v9 = vld [vmem:[#allocation2 + $0x1] ss:$4 sm:$0x3]  ;;  %603 = vmatprep.subr.mxu0 %v729_v37 }
  0x27   : > { %256 = vadd.xlane.f32.xlu0 %v255_v6  ;;  %279 = vadd.xlane.f32.xlu1 %v278_v8  ;;  %v266_v10 = vsel %vm254_vm0, %v265_v9, 0.0  ;;  %v289_v11 = vld [vmem:[#allocation2 + $0x3] ss:$4 sm:$0x3] }
  0x28   : > { %v290_v12 = vsel %vm254_vm0, %v289_v11, 0.0  ;;  %604 = vmatpush3.msra.mxu0 %v388_v40  ;;  %v586_v11 = vld [vmem:[%s898_s4] ss:$0 sm:$0xff] }
  0x29   : > { %605 = vmatprep.subr.mxu0 %v729_v37 }
  0x2a   : > { %606 = vmatpush3.msra.mxu0 %v387_v41 }
  0x2b   : > { %267 = vadd.xlane.f32.xlu0 %v266_v10  ;;  %291 = vadd.xlane.f32.xlu1 %v290_v12 }
  0x2c   : > { %607 = vmatprep.subr.mxu0 %v729_v37 }
  0x2d   : > { %608 = vmatpush3.msra.mxu0 %v386_v44 }
  0x2e   : > { %609 = vmatprep.subr.mxu0 %v729_v37 }
  0x2f   : > { %610 = vmatpush3.msra.mxu0 %v385_v47 }
  0xb0   : > { %v257_v13 = vpop.xlane.xlu0 %256  ;;  %v280_v14 = vpop.xlane.xlu1 %279 }
  0xb1   : > { %v263_v20 = vmul.f32 %v580_v15, %v257_v13  ;;  %v286_v23 = vmul.f32 %v582_v17, %v280_v14 }
  0xb4   : > { %v268_v18 = vpop.xlane.xlu0 %267  ;;  %v292_v22 = vpop.xlane.xlu1 %291 }
  0xb5   : > { %v274_v21 = vmul.f32 %v581_v16, %v268_v18  ;;  %v298_v25 = vmul.f32 %v583_v19, %v292_v22 }
  0xb7   : > { %v275_v24 = vadd.f32 %v274_v21, %v263_v20 }
  0xb9   : > { %v287_v26 = vadd.f32 %v286_v23, %v275_v24 }
  0xbb   : > { %v299_v28 = vadd.f32 %v298_v25, %v287_v26 }
  0xbd   : > { %v307_v29 = vadd.f32 %v584_v27, %v299_v28 }
  0xbf   : > { %v585_v30 = vmul.f32 -1.442695, %v307_v29 }
  0xc1   : > { %657 = vpow2.f32 %v585_v30 }
  0xce   : > { %v658_v31 = vpop.eup %657 }
  0xcf   : > { %v311_v32 = vadd.f32 1.0, %v658_v31 }
  0xd1   : > { %659 = vrcp.f32 %v311_v32 }
  0xde   : > { %v799_v33 = vpop.eup %659 }
  0xdf   : > { %v314_v34 = vsub.f32 1.0, %v799_v33 }
  0xe1   : > { %316 = vrot.lane.b32.xlu0 %v314_v34, %s720_s13 }
 0x153   : > { %v317_v35 = vpop.permute.xlu0 %316 }
 0x154   : > { %v804_v36 = vsel %vm319_vm1, %v799_v33, %v317_v35 }
 0x155   : > { %340 = vrot.lane.b32.xlu0 %v804_v36, %s720_s13  ;;  %351 = vrot.lane.b32.xlu1 %v804_v36, %s721_s14 }
 0x159   : > { %343 = vrot.lane.b32.xlu0 %v804_v36, %s722_s15  ;;  %337 = vrot.lane.b32.xlu1 %v804_v36, %s723_s16 }
 0x15d   : > { %357 = vrot.lane.b32.xlu1 %v804_v36, %s724_s17 }
 0x161   : > { %363 = vrot.lane.b32.xlu1 %v804_v36, %s725_s18 }
 0x165   : > { %322 = vrot.lane.b32.xlu1 %v804_v36, %s726_s23 }
 0x169   : > { %325 = vrot.lane.b32.xlu1 %v804_v36, %s727_s24 }
 0x16d   : > { %328 = vrot.lane.b32.xlu1 %v804_v36, %s728_s25 }
 0x1c7   : > { %v341_v42 = vpop.permute.xlu0 %340  ;;  %v352_v43 = vpop.permute.xlu1 %351 }
 0x1c8   : > { %v354_v45 = vsel %vm346_vm2, %v352_v43, %v804_v36 }
 0x1cb   : > { %v338_v46 = vpop.permute.xlu1 %337  ;;  %v344_v50 = vpop.permute.xlu0 %343 }
 0x1cc   : > { %v347_v48 = vsel %vm346_vm2, %v804_v36, %v338_v46  ;;  %v355_v49 = vsel %vm319_vm1, %v354_v45, %v338_v46 }
 0x1cd   : > { %v348_v51 = vsel %vm319_vm1, %v347_v48, %v341_v42  ;;  %v356_v52 = vsel %vm349_vm3, %v355_v49, %v341_v42 }
 0x1ce   : > { %370 = vrot.lane.b32.xlu0 %v356_v52, %s726_s23  ;;  %v350_v53 = vsel %vm349_vm3, %v348_v51, %v344_v50 }
 0x1cf   : > { %v358_v54 = vpop.permute.xlu1 %357 }
 0x1d0   : > { %v360_v55 = vsel %vm346_vm2, %v358_v54, %v352_v43 }
 0x1d1   : > { %v361_v56 = vsel %vm319_vm1, %v360_v55, %v804_v36 }
 0x1d2   : > { %v362_v57 = vsel %vm349_vm3, %v361_v56, %v338_v46 }
 0x1d3   : > { %374 = vrot.lane.b32.xlu0 %v362_v57, %s727_s24  ;;  %v364_v58 = vpop.permute.xlu1 %363 }
 0x1d4   : > { %v366_v59 = vsel %vm346_vm2, %v364_v58, %v358_v54 }
 0x1d5   : > { %v367_v60 = vsel %vm319_vm1, %v366_v59, %v352_v43 }
 0x1d6   : > { %v368_v61 = vsel %vm349_vm3, %v367_v60, %v804_v36 }
 0x1d7   : > { %378 = vrot.lane.b32.xlu0 %v368_v61, %s728_s25  ;;  %v323_v62 = vpop.permute.xlu1 %322 }
 0x1d8   : > { %v332_v3 = vsel %vm331_vm5, %v804_v36, %v323_v62 }
 0x1db   : > { %v326_v0 = vpop.permute.xlu1 %325 }
 0x1dc   : > { %v334_v5 = vsel %vm333_vm6, %v332_v3, %v326_v0 }
 0x1df   : > { %v329_v2 = vpop.permute.xlu1 %328 }
 0x1e0   : > { %v336_v8 = vsel %vm335_vm7, %v334_v5, %v329_v2 }
 0x240   : > { %v371_v63 = vpop.permute.xlu0 %370 }
 0x241   : > { %v381_v4 = vsel %vm331_vm5, %v350_v53, %v371_v63 }
 0x245   : > { %v375_v1 = vpop.permute.xlu0 %374 }
 0x246   : > { %v382_v6 = vsel %vm333_vm6, %v381_v4, %v375_v1 }
 0x249   : > { %v379_v7 = vpop.permute.xlu0 %378 }
 0x24a   : > { %v383_v9 = vsel %vm335_vm7, %v382_v6, %v379_v7 }
 0x24b   : > { %v384_v10 = vmul.f32 %v383_v9, %v336_v8 }
 0x24d   : > { %612 = vmatmul.mubr.msk.f32.vlgmr.msra.gmra.mxu0 %vm398_vm8, %v384_v10 }
 0x30d   : > { %v468_v12 = vpop.f32.mrf.mxu0 }
 0x30e   : > { %v469_v13 = vadd.f32 %v586_v11, %v468_v12 }
 0x30f   : > { %v613_v14 = vpop.f32.mrf.mxu0 }
 0x310   : > { %473 = vrot.lane.b32.xlu1 %v469_v13, %s721_s14 }
 0x382   : > { %v474_v15 = vpop.permute.xlu1 %473 }
 0x383   : > { %v476_v16 = vmax.f32 %v469_v13, %v474_v15 }
 0x385   : > { %481 = vrot.lane.b32.xlu0 %v476_v16, %s723_s16  ;;  %v477_v21 = vsub.f32 %v469_v13, %v476_v16 }
 0x387   : > { %v478_v22 = vmul.f32 1.442695, %v477_v21 }
 0x3f7   : > { %v482_v17 = vpop.permute.xlu0 %481 }
 0x3f8   : > { %v484_v18 = vsub.f32 %v469_v13, %v482_v17 }
 0x3fa   : > { %v485_v19 = vmul.f32 1.442695, %v484_v18 }
 0x3fc   : > { %661 = vpow2.f32 %v485_v19 }
 0x3fd   : > { %663 = vpow2.f32 %v478_v22 }
 0x409   : > { %v662_v20 = vpop.eup %661 }
 0x40a   : > { %488 = vrot.lane.b32.xlu1 %v662_v20, %s721_s14  ;;  %v664_v23 = vpop.eup %663 }
 0x47c   : > { %v489_v24 = vpop.permute.xlu1 %488 }
 0x47d   : > { %v491_v25 = vadd.f32 %v664_v23, %v489_v24 }
 0x47f   : > { %665 = vrcp.f32 %v491_v25 }
 0x48c   : > { %v666_v26 = vpop.eup %665 }
 0x48d   : > { %496 = vrot.lane.b32.xlu0 %v666_v26, %s723_s16  ;;  %v493_v27 = vmul.f32 %v666_v26, %v664_v23 }
 0x48f   : > { %v494_v31 = vmul.f32 %v799_v33, %v493_v27 }
 0x4ff   : > { %v497_v28 = vpop.permute.xlu0 %496 }
 0x500   : > { %v499_v29 = vmul.f32 %v662_v20, %v497_v28 }
 0x502   : > { %v500_v30 = vmul.f32 %v799_v33, %v499_v29 }
 0x504   : > { %502 = vrot.lane.b32.xlu1 %v500_v30, %s721_s14 }
 0x576   : > { %v503_v32 = vpop.permute.xlu1 %502 }
 0x577   : > { %v505_v34 = vadd.f32 %v503_v32, %v494_v31 }
 0x579   : > { %507 = vst.msk [vmem:[#allocation3] sm:$0x3] %vm506_vm9, %v505_v34 }
 0x57a PF: > { %p870_p7 = scmp.eq.s32.totalorder %s573_s21, 1  ;;  %s731_s16 = smov [#allocation3]  }
 0x57b   : > { %s517_s18 = sshll.u32 %s731_s16, 4  ;;  %s518_s18 = int_to_ptr.vmem [resolvable:$true] %s517_s18 }
 0x57c   : > { %s667_s23 = scalar_lea.vmem %s518_s18, 32  ;;  %p674_p11 = scmp.lt.s32.totalorder %s518_s18, %s518_s18 }
 0x57d   : > { %p668_p8 = scmp.ne.s32.totalorder %s518_s18, %s667_s23  ;;  %p675_p12 = scmp.lt.s32.totalorder %s667_s23, %s667_s23 }
 0x57f   : > { %p669_p9 = pnand %p668_p8, %p870_p7  ;;  %p676_p13 = por %p675_p12, %p674_p11 }
 0x581   : > { %p670_p10 = pneg %p669_p9 }
 0x583   : > { %p677_p0 = pnand %p676_p13, %p670_p10 }
 0x585   : > { %680 = shalt.err (!%p677_p0)
}
 0x586   : > { %615 = dma.vmem_to_hbm [thread:$0]  (%p870_p7), %s518_s18, 32, %s899_s5, [#allocation4]  }
 0x587   : > { %704 = dma.done.wait (%p870_p7), [#allocation4], 32  }
 0x588   : > { %706 = vsyncadd (%p870_p7), [#allocation4], 4294967264 }
 0x589 PF: > { %s16_s20 = sadd.s32 1, %s717_s20   ;;  %s901_s18 = smov %s713_s19 }
 0x58a   : > { %p13_p1 = scmp.ge.s32.totalorder %s16_s20, 4   ;;  %s902_s19 = smov %s904_s22 }
 0x58c   :  { %15 = sbr.rel (!%p13_p1) target bundleno = 2 (0x2), region = 79 }
 0x591   :  { %530 = vsyncpa [#allocation4], 1 }
 0x592   :  { %532 = vsyncpa [#allocation4 + $0x1], 1 }

</bundles_post_ra>
